<compile_context>
chip_gen: v5e
topology: v5e:2x2
jax: 0.10.0
libtpu: 0.0.40
codegen_flags: <defaults>
</compile_context>

<pallas_src>
import jax
import jax.numpy as jnp
from jax.experimental import pallas as pl
from jax.experimental.pallas import tpu as pltpu


def tanh_attention_kernel(hidden_ref, mask_ref, w1_ref, b1_ref, w2_ref, out_ref):
    """One grid step processes `tb` batch rows (= tb*S flattened sequence rows).

    hidden_ref: (tb*S, H) bf16   flattened (batch, seq) rows of hidden
    mask_ref:   (tb, S)   f32    1.0 = keep, 0.0 = pad
    w1_ref:     (H, K)    bf16   Linear(H, K).weight transposed
    b1_ref:     (1, K)    f32    Linear(H, K).bias
    w2_ref:     (1, K)    f32    Linear(K, 1, bias=False).weight (row vector)
    out_ref:    (tb, S)   f32    attention weights
    """
    tb, S = out_ref.shape
    K = w1_ref.shape[1]

    # Linear(H -> K) as a single 2-D GEMM (MXU, bf16 in / f32 accumulate),
    # bias-add + tanh (EUP) in f32.
    z = jnp.tanh(
        jnp.dot(hidden_ref[...], w1_ref[...], preferred_element_type=jnp.float32)
        + b1_ref[...]
    )                                                            # (tb*S, K) f32

    # Linear(K -> 1, no bias) as a VPU multiply + lane reduction (an N=1 MXU
    # matmul would waste 127/128 of the output lanes and the result FIFO).
    w2 = w2_ref[...]                                             # (1, K) f32
    scores = jnp.sum(z.reshape(tb, S, K) * w2[None, :, :], axis=-1)   # (tb, S) f32

    # Masked softmax over the sequence axis (f32 epilogue).
    mask = mask_ref[...]                                         # (tb, S) f32
    neg = jnp.float32(-1e30)
    ms = jnp.where(mask > 0, scores, neg)
    m = jnp.max(ms, axis=-1, keepdims=True)
    e = jnp.exp(ms - m) * mask
    denom = jnp.sum(e, axis=-1, keepdims=True) + jnp.float32(1e-13)
    out_ref[...] = e / denom


def _pick_block_b(B: int, S: int, H: int) -> int:
    """Rows-per-step heuristic.

    Target ~512 flattened rows per step (multiple of 256 for the v6e/v7x 256x256
    MXU; also a multiple of 128 for v5e), bounded so the double-buffered bf16
    hidden tile stays well inside the scoped-VMEM budget (sized with v7x's
    64 MiB per-TC VMEM in mind), and clamped to B.
    """
    vmem_budget = 24 * 1024 * 1024            # bytes for 2x hidden input buffers
    tb = max(1, 512 // max(S, 1))
    while tb > 1 and 2 * tb * S * H * 2 > vmem_budget:
        tb //= 2
    if tb >= B:
        return B
    # Keep the mask/out sublane dim (tb) 8-aligned when actually tiling.
    return max(8, (tb // 8) * 8)


def tanh_attention(hidden, masks, w1, b1, w2, *, block_b=None):
    B, S, H = hidden.shape
    K = w1.shape[1]
    tb = _pick_block_b(B, S, H) if block_b is None else block_b
    grid = (pl.cdiv(B, tb),)

    # bf16 GEMM inputs (halves HBM traffic for `hidden`, doubles MXU throughput);
    # accumulation and the tanh/softmax epilogue stay f32.
    hidden2d = hidden.reshape(B * S, H).astype(jnp.bfloat16)
    w1b = w1.astype(jnp.bfloat16)
    b1f = jnp.reshape(b1, (1, K)).astype(jnp.float32)
    w2f = jnp.reshape(w2, (1, K)).astype(jnp.float32)
    masksf = masks.astype(jnp.float32)

    return pl.pallas_call(
        tanh_attention_kernel,
        out_shape=jax.ShapeDtypeStruct((B, S), jnp.float32),
        grid_spec=pltpu.PrefetchScalarGridSpec(
            num_scalar_prefetch=0,
            grid=grid,
            in_specs=[
                pl.BlockSpec((tb * S, H), lambda i: (i, 0)),   # hidden rows (pipelined)
                pl.BlockSpec((tb, S), lambda i: (i, 0)),       # mask tile
                pl.BlockSpec((H, K), lambda i: (0, 0)),        # w1 (resident across steps)
                pl.BlockSpec((1, K), lambda i: (0, 0)),        # b1
                pl.BlockSpec((1, K), lambda i: (0, 0)),        # w2
            ],
            out_specs=pl.BlockSpec((tb, S), lambda i: (i, 0)),
        ),
        compiler_params=pltpu.CompilerParams(
            dimension_semantics=("parallel",),   # batch tiles shard across TCs (v7x)
            vmem_limit_bytes=48 * 1024 * 1024,
        ),
    )(hidden2d, masksf, w1b, b1f, w2f)


if __name__ == "__main__":
    B, S, H = 2, 8, 32
    K = H // 2

    key = jax.random.PRNGKey(0)
    k1, k2, k3, k4, k5 = jax.random.split(key, 5)

    hidden = jax.random.normal(k1, (B, S, H), jnp.float32)
    masks = (jax.random.uniform(k2, (B, S)) > 0.3).astype(jnp.float32)
    masks = masks.at[:, 0].set(1.0)  # ensure each row has at least one valid position

    # Deterministic synthetic parameters (shapes follow the nn.Linear layers).
    w1 = jax.random.normal(k3, (H, K), jnp.float32) * 0.1   # Linear(H, H//2).weight.T
    b1 = jax.random.normal(k4, (K,), jnp.float32) * 0.1     # Linear(H, H//2).bias
    w2 = jax.random.normal(k5, (1, K), jnp.float32) * 0.1   # Linear(H//2, 1).weight

    out = jax.block_until_ready(tanh_attention(hidden, masks, w1, b1, w2))

    # Pure-JAX reference using the same bf16 GEMM inputs / f32 accumulation as the kernel.
    h_bf = hidden.astype(jnp.bfloat16).astype(jnp.float32)
    w1_bf = w1.astype(jnp.bfloat16).astype(jnp.float32)
    z_ref = jnp.tanh(h_bf @ w1_bf + b1[None, None, :])
    scores_ref = jnp.sum(z_ref * w2[0][None, None, :], axis=-1)
    ms = jnp.where(masks > 0, scores_ref, -1e30)
    e = jnp.exp(ms - ms.max(-1, keepdims=True)) * masks
    ref = e / (e.sum(-1, keepdims=True) + 1e-13)

    assert out.shape == (B, S)
    assert jnp.allclose(out, ref, atol=1e-4, rtol=1e-4), "kernel output mismatch vs reference"
    print("KERNEL_OK")
</pallas_src>

<mosaic_0001>
module attributes {stable_mosaic.version = 11 : i64} {
  func.func @tanh_attention_kernel(%arg0: i32, %arg1: memref<16x32xbf16, #tpu.memory_space<vmem>>, %arg2: memref<2x8xf32, #tpu.memory_space<vmem>>, %arg3: memref<32x16xbf16, #tpu.memory_space<vmem>>, %arg4: memref<1x16xf32, #tpu.memory_space<vmem>>, %arg5: memref<1x16xf32, #tpu.memory_space<vmem>>, %arg6: memref<2x8xf32, #tpu.memory_space<vmem>>) attributes {dimension_semantics = [#tpu.dimension_semantics<parallel>], iteration_bounds = array<i64: 1>, scalar_prefetch = 0 : i64, scratch_operands = 0 : i64, tpu.core_type = #tpu.core_type<tc>, window_params = [{transform_indices = @transform_0, window_bounds = array<i64: 16, 32>}, {transform_indices = @transform_1, window_bounds = array<i64: 2, 8>}, {pipeline_mode = #tpu.pipeline_mode<synchronous>, transform_indices = @transform_2, window_bounds = array<i64: 32, 16>}, {pipeline_mode = #tpu.pipeline_mode<synchronous>, transform_indices = @transform_3, window_bounds = array<i64: 1, 16>}, {pipeline_mode = #tpu.pipeline_mode<synchronous>, transform_indices = @transform_4, window_bounds = array<i64: 1, 16>}, {transform_indices = @transform_5, window_bounds = array<i64: 2, 8>}]} {
    %c0 = arith.constant 0 : index
    %c0_0 = arith.constant 0 : index
    %0 = vector.load %arg1[%c0, %c0_0] : memref<16x32xbf16, #tpu.memory_space<vmem>>, vector<16x32xbf16>
    %c0_1 = arith.constant 0 : index
    %c0_2 = arith.constant 0 : index
    %1 = vector.load %arg3[%c0_1, %c0_2] : memref<32x16xbf16, #tpu.memory_space<vmem>>, vector<32x16xbf16>
    %cst = arith.constant dense<0.000000e+00> : vector<16x16xf32>
    %2 = tpu.matmul %0, %1, %cst {dimension_numbers = #tpu.dot_dimension_numbers<[1], [0], [0], [1], [0, 0, 1, 1], [], []>} : vector<16x32xbf16>, vector<32x16xbf16>, vector<16x16xf32> -> vector<16x16xf32>
    %c0_3 = arith.constant 0 : index
    %c0_4 = arith.constant 0 : index
    %3 = vector.load %arg4[%c0_3, %c0_4] : memref<1x16xf32, #tpu.memory_space<vmem>>, vector<1x16xf32>
    %4 = vector.broadcast %3 : vector<1x16xf32> to vector<16x16xf32>
    %5 = arith.addf %2, %4 : vector<16x16xf32>
    %6 = math.tanh %5 : vector<16x16xf32>
    %c0_5 = arith.constant 0 : index
    %c0_6 = arith.constant 0 : index
    %7 = vector.load %arg5[%c0_5, %c0_6] : memref<1x16xf32, #tpu.memory_space<vmem>>, vector<1x16xf32>
    %8 = vector.shape_cast %6 : vector<16x16xf32> to vector<2x8x16xf32>
    %9 = vector.shape_cast %7 : vector<1x16xf32> to vector<1x1x16xf32>
    %10 = vector.broadcast %9 : vector<1x1x16xf32> to vector<2x8x16xf32>
    %11 = arith.mulf %8, %10 : vector<2x8x16xf32>
    %cst_7 = arith.constant dense<0.000000e+00> : vector<2x8xf32>
    %12 = vector.multi_reduction <add>, %11, %cst_7 [2] : vector<2x8x16xf32> to vector<2x8xf32>
    %c0_8 = arith.constant 0 : index
    %c0_9 = arith.constant 0 : index
    %13 = vector.load %arg2[%c0_8, %c0_9] : memref<2x8xf32, #tpu.memory_space<vmem>>, vector<2x8xf32>
    %cst_10 = arith.constant 0.000000e+00 : f32
    %14 = vector.broadcast %cst_10 : f32 to vector<2x8xf32>
    %15 = arith.cmpf ogt, %13, %14 : vector<2x8xf32>
    %cst_11 = arith.constant -1.000000e+30 : f32
    %16 = vector.broadcast %cst_11 : f32 to vector<2x8xf32>
    %17 = arith.select %15, %12, %16 : vector<2x8xi1>, vector<2x8xf32>
    %cst_12 = arith.constant dense<0xFF800000> : vector<2xf32>
    %18 = vector.multi_reduction <maximumf>, %17, %cst_12 [1] : vector<2x8xf32> to vector<2xf32>
    %19 = vector.shape_cast %18 : vector<2xf32> to vector<2x1xf32>
    %20 = vector.broadcast %19 : vector<2x1xf32> to vector<2x8xf32>
    %21 = arith.subf %17, %20 : vector<2x8xf32>
    %22 = math.exp %21 : vector<2x8xf32>
    %23 = arith.mulf %22, %13 : vector<2x8xf32>
    %cst_13 = arith.constant dense<0.000000e+00> : vector<2xf32>
    %24 = vector.multi_reduction <add>, %23, %cst_13 [1] : vector<2x8xf32> to vector<2xf32>
    %25 = vector.shape_cast %24 : vector<2xf32> to vector<2x1xf32>
    %cst_14 = arith.constant 9.99999982E-14 : f32
    %26 = vector.broadcast %cst_14 : f32 to vector<2x1xf32>
    %27 = arith.addf %25, %26 : vector<2x1xf32>
    %28 = vector.broadcast %27 : vector<2x1xf32> to vector<2x8xf32>
    %29 = arith.divf %23, %28 : vector<2x8xf32>
    %c0_15 = arith.constant 0 : index
    %c0_16 = arith.constant 0 : index
    %30 = vector.load %arg6[%c0_15, %c0_16] : memref<2x8xf32, #tpu.memory_space<vmem>>, vector<2x8xf32>
    tpu.vector_store %arg6[%c0_15, %c0_16], %29 {strides = array<i32>} : memref<2x8xf32, #tpu.memory_space<vmem>>, vector<2x8xf32>,
    return
  }
  func.func @transform_0(%arg0: i32) -> (i32, i32) {
    %c0_i32 = arith.constant 0 : i32
    %c0_i32_0 = arith.constant 0 : i32
    return %arg0, %c0_i32 : i32, i32
  }
  func.func @transform_1(%arg0: i32) -> (i32, i32) {
    %c0_i32 = arith.constant 0 : i32
    %c0_i32_0 = arith.constant 0 : i32
    return %arg0, %c0_i32 : i32, i32
  }
  func.func @transform_2(%arg0: i32) -> (i32, i32) {
    %c0_i32 = arith.constant 0 : i32
    %c0_i32_0 = arith.constant 0 : i32
    %c0_i32_1 = arith.constant 0 : i32
    return %c0_i32, %c0_i32_0 : i32, i32
  }
  func.func @transform_3(%arg0: i32) -> (i32, i32) {
    %c0_i32 = arith.constant 0 : i32
    %c0_i32_0 = arith.constant 0 : i32
    %c0_i32_1 = arith.constant 0 : i32
    return %c0_i32, %c0_i32_0 : i32, i32
  }
  func.func @transform_4(%arg0: i32) -> (i32, i32) {
    %c0_i32 = arith.constant 0 : i32
    %c0_i32_0 = arith.constant 0 : i32
    %c0_i32_1 = arith.constant 0 : i32
    return %c0_i32, %c0_i32_0 : i32, i32
  }
  func.func @transform_5(%arg0: i32) -> (i32, i32) {
    %c0_i32 = arith.constant 0 : i32
    %c0_i32_0 = arith.constant 0 : i32
    return %arg0, %c0_i32 : i32, i32
  }
}

</mosaic_0001>

<bundles_post_ra>
// kernel: tpu_custom_call.1
= control target key start
LH: loop header
LB: loop body
LE: loop exit
PB: predicated region body
PF: predicated region fallthrough
CT: control target
= control target key end

     0   :  { %s246_s0 = inlined_call_operand.vmem [shape: bf16[16,32], index: 0, kind: input, shape index: {}]   ;;  %s247_s1 = inlined_call_operand.vmem [shape: f32[2,8], index: 1, kind: input, shape index: {}]   ;;  %s248_s2 = inlined_call_operand.vmem [shape: bf16[32,16], index: 2, kind: input, shape index: {}]   ;;  %s249_s3 = inlined_call_operand.vmem [shape: f32[1,16], index: 3, kind: input, shape index: {}]   ;;  %s250_s4 = inlined_call_operand.vmem [shape: f32[1,16], index: 4, kind: input, shape index: {}]   ;;  %s251_s5 = inlined_call_operand.hbm [shape: f32[2,8], index: 5, kind: output, shape index: {}]  }
   0x1   :  { %v153_v0 = vld [vmem:[%s248_s2 + $0x8] sm:$0xff]  ;;  %v152_v1 = vld [vmem:[%s248_s2] sm:$0xff] }
   0x2   :  { %59 = vmatpush.bf16.msra.mxu0 %v153_v0 }
   0x3   :  { %10 = vsyncpa [#allocation3], 0  ;;  %v151_v2 = vld [vmem:[%s246_s0] sm:$0xff]  ;;  %vm49_vm0 = vcmask 261120   ;;  %vm75_vm1 = vcmask 130048   ;;  %v86_v16 = vlaneseq  ;;  %vm90_vm2 = vcmask 1041409  }
   0x4   :  { %v155_v3 = vld [vmem:[%s249_s3] ss:$0 sm:$0xff]  ;;  %vm94_vm4 = vcmask 58368   ;;  %s129_s29 = sshll.u32 %s251_s5, 4  ;;  %s130_s29 = int_to_ptr.hbm [resolvable:$true] %s129_s29 }
   0x5   :  { %v156_v6 = vld [vmem:[%s250_s4] ss:$0 sm:$0xff]  ;;  %v87_v17 = vand.u32 127, %v86_v16 }
   0x6   :  { %60 = vmatpush.bf16.msra.mxu0 %v152_v1  ;;  %v82_v18 = vld [vmem:[%s247_s1] sm:$0x3]  ;;  %s191_s1 = smov [#allocation2]  }
   0x7   :  { %vm83_vm3 = vcmp.gt.f32.partialorder %v82_v18, 0.0  ;;  %s127_s3 = sshll.u32 %s191_s1, 4  ;;  %s128_s3 = int_to_ptr.vmem [resolvable:$true] %s127_s3 }
   0x9   :  { %150 = vmatmul.msk.bf16.vlgmr.msra.gmra.mxu0 %vm49_vm0, %v151_v2 }
  0x86   :  { %v62_v4 = vpop.f32.mrf.mxu0 }
  0x87   :  { %v63_v5 = vadd.f32 %v155_v3, %v62_v4 }
  0x89   :  { %157 = vtanh.f32 %v63_v5 }
  0x8e   :  { %v64_v7 = vpop.f32.mrf.mxu0 }
  0x8f   :  { %v158_v8 = vpop.eup %157  ;;  %v65_v9 = vadd.f32 %v155_v3, %v64_v7 }
  0x90   :  { %v73_v10 = vmul.f32 %v158_v8, %v156_v6 }
  0x91   :  { %159 = vtanh.f32 %v65_v9 }
  0x92   :  { %v76_v11 = vsel %vm75_vm1, %v73_v10, 0.0 }
  0x93   :  { %77 = vadd.xlane.f32.xlu0 %v76_v11 }
  0x97   :  { %v160_v12 = vpop.eup %159 }
  0x98   :  { %v74_v13 = vmul.f32 %v160_v12, %v156_v6 }
  0x9a   :  { %v79_v14 = vsel %vm75_vm1, %v74_v13, 0.0 }
  0x9b   :  { %80 = vadd.xlane.f32.xlu0 %v79_v14 }
 0x106   :  { %v78_v15 = vpop.xlane.xlu0 %77 }
 0x107   :  { %v88_v20 = vperm.slane %v78_v15, %v87_v17 }
 0x10e   :  { %v81_v19 = vpop.xlane.xlu0 %80 }
 0x10f   :  { %v89_v21 = vperm.slane %v81_v19, %v87_v17 }
 0x111   :  { %v91_v22 = vsel %vm90_vm2, %v89_v21, %v88_v20 }
 0x112   :  { %v93_v23 = vsel %vm83_vm3, %v91_v22, -1e+30 }
 0x113   :  { %v95_v24 = vsel %vm94_vm4, %v93_v23, -inf }
 0x114   :  { %96 = vmax.xlane.f32.xlu1 %v95_v24 }
 0x187   :  { %v97_v25 = vpop.xlane.xlu1 %96 }
 0x188   :  { %v98_v26 = vsub.f32 %v93_v23, %v97_v25 }
 0x18a   :  { %v99_v27 = vmul.f32 1.442695, %v98_v26 }
 0x18c   :  { %161 = vpow2.f32 %v99_v27 }
 0x192   :  { %v162_v28 = vpop.eup %161 }
 0x193   :  { %v101_v29 = vmul.f32 %v162_v28, %v82_v18 }
 0x195   :  { %v102_v30 = vsel %vm94_vm4, %v101_v29, 0.0 }
 0x196   :  { %103 = vadd.xlane.f32.xlu1 %v102_v30 }
 0x209   :  { %v104_v31 = vpop.xlane.xlu1 %103 }
 0x20a   :  { %v105_v32 = vadd.f32 1e-13, %v104_v31 }
 0x20c   :  { %163 = vrcp.f32 %v105_v32  ;;  %v117_v36 = vand.u32 2147483648, %v105_v32  ;;  %v115_v38 = vand.u32 2147483647, %v105_v32  ;;  %vm111_vm6 = vweird.f32 %v105_v32 }
 0x20e   :  { %v118_v40 = vor.u32 1.1754944e-38, %v117_v36  ;;  %vm116_vm8 = vcmp.eq.f32.partialorder %v115_v38, 8.507059e+37 }
 0x212   :  { %v164_v33 = vpop.eup %163 }
 0x213   :  { %v107_v34 = vmul.f32 %v164_v33, %v105_v32  ;;  %vm112_vm5 = vweird.f32 %v164_v33 }
 0x214   :  { %vm113_vm7 = vmor %vm111_vm6, %vm112_vm5 }
 0x215   :  { %v108_v35 = vsub.f32 1.0, %v107_v34 }
 0x217   :  { %v109_v37 = vmul.f32 %v164_v33, %v108_v35 }
 0x219   :  { %v110_v39 = vadd.f32 %v164_v33, %v109_v37 }
 0x21b   :  { %v114_v41 = vsel %vm113_vm7, %v164_v33, %v110_v39 }
 0x21c   :  { %v119_v42 = vsel %vm116_vm8, %v118_v40, %v114_v41 }
 0x21d   :  { %v120_v43 = vmul.f32 %v119_v42, %v101_v29 }
 0x21f   :  { %121 = vst.msk [vmem:[#allocation2] sm:$0x3] %vm94_vm4, %v120_v43 }
 0x220   :  { %132 = dma.vmem_to_hbm [thread:$0]  %s128_s3, 32, %s130_s29, [#allocation3]  }
 0x221   :  { %189 = dma.done.wait [#allocation3], 32  }
 0x222   :  { %190 = vsyncadd [#allocation3], 4294967264 }
 0x223   :  { %137 = vsyncpa [#allocation3], 1 }

</bundles_post_ra>
